<compile_context>
chip_gen: v6e
topology: v6e:2x2x1
jax: 0.10.0
libtpu: 0.0.40
codegen_flags: <defaults>
</compile_context>

<pallas_src>
import math
import numpy as np
import jax
import jax.numpy as jnp
from jax.experimental import pallas as pl
from jax.experimental.pallas import tpu as pltpu

# ------------------------------ hyperparameters ------------------------------
BATCH = 2
SEQ_LEN = 10
EMBED_DIM = 32
N_HEADS = 8
HEAD_DIM = EMBED_DIM // N_HEADS


# -------------------------------- Pallas kernel -------------------------------

def _mha_fused_kernel(q_ref, k_ref, v_ref, w_ref, rm_ref, hm_ref, g_ref, o_ref):
    """Fully fused, fully batched MHA forward.

    Shapes (for B=2, Sq=Sk=10, E=32, H=8):
      q_ref/k_ref/v_ref : (B*S, E)        = (20, 32)
      w_ref             : (5, E, E)       = [Wq_blk/sqrt(Dh), Wk_blk, Wv_blk,
                                             Wo^T, bias slab (row 0 = b_o)]
      rm_ref            : (2, B*H*Sq, B*Sk) = [R (query replication),
                                               cross-batch -1e30 mask]
      hm_ref            : (B*H*Sq, E)     = one-hot head-lane selector rows
      g_ref             : (B*Sq, B*H*Sq)  = head re-concatenation (sum) matrix
      o_ref             : (B*Sq, E)
    """
    # Head-fused projections: lane-dense (B*S, E) @ (E, E) matmuls against the
    # block-diagonal kron(I_H, W^T) weights (1/sqrt(Dh) folded into Wq).
    qp = jnp.dot(q_ref[...], w_ref[0], preferred_element_type=jnp.float32)
    kp = jnp.dot(k_ref[...], w_ref[1], preferred_element_type=jnp.float32)
    vp = jnp.dot(v_ref[...], w_ref[2], preferred_element_type=jnp.float32)

    hm = hm_ref[...]                                      # (B*H*Sq, E)

    # Per-head query replication on the MXU (no reshape/tile/relayout), then
    # mask each row to its own head's lanes.
    qexp = jnp.dot(rm_ref[0], qp, preferred_element_type=jnp.float32) * hm

    # One batched score contraction over E, for all (batch, head, query) rows
    # against all (batch, key) columns; cross-batch entries are pushed to
    # -1e30 before the softmax.
    s = jax.lax.dot_general(qexp, kp, (((1,), (1,)), ((), ())),
                            preferred_element_type=jnp.float32)  # (B*H*Sq, B*Sk)
    s = s + rm_ref[1]
    # TODO(synk): the reference's optional `mask` (masked_fill) branch is not
    # implemented; the module is exercised with mask=None.

    m = jnp.max(s, axis=-1, keepdims=True)
    e = jnp.exp(s - m)
    p = e * pl.reciprocal(jnp.sum(e, axis=-1, keepdims=True), approx=True)

    # Context for every (batch, head, query) row, then head re-concatenation
    # as a single MXU matmul against the precomputed gather/sum matrix G.
    ctx = jnp.dot(p, vp, preferred_element_type=jnp.float32)        # (B*H*Sq, E)
    concat = jnp.dot(g_ref[...], ctx * hm,
                     preferred_element_type=jnp.float32)            # (B*Sq, E)

    # Output Linear: pre-transposed weight + bias (row 0 of slab 4).
    o_ref[...] = (jnp.dot(concat, w_ref[3], preferred_element_type=jnp.float32)
                  + w_ref[4][0:1, :])


# ------------------------ one-time host-side constant prep ---------------------

def prepare_constants(params, batch, seq_q, seq_k):
    """Build all kernel constants ONCE (outside the per-call path)."""
    assert seq_q == seq_k, "packed R / cross-mask assumes equal q/k lengths"
    E, H, Dh = EMBED_DIM, N_HEADS, HEAD_DIM
    inv_scale = 1.0 / math.sqrt(Dh)
    eye_h = np.eye(H, dtype=np.float32)

    wq_blk = np.kron(eye_h, np.asarray(params["wq"]).T) * inv_scale   # (E, E)
    wk_blk = np.kron(eye_h, np.asarray(params["wk"]).T)               # (E, E)
    wv_blk = np.kron(eye_h, np.asarray(params["wv"]).T)               # (E, E)
    wo_t = np.asarray(params["wo"], dtype=np.float32).T               # (E, E)
    bias_slab = np.zeros((E, E), np.float32)
    bias_slab[0] = np.asarray(params["bo"], dtype=np.float32)
    w_pack = np.stack([wq_blk, wk_blk, wv_blk, wo_t, bias_slab])      # (5, E, E)

    # Row index layout of the 160-row working set: (b, h, q).
    b_idx = np.repeat(np.arange(batch), H * seq_q)
    h_idx = np.tile(np.repeat(np.arange(H), seq_q), batch)
    q_idx = np.tile(np.arange(seq_q), batch * H)
    bhq = batch * H * seq_q
    bsq = batch * seq_q
    bsk = batch * seq_k

    # R: replicate projected-query row (b, q) into every head row (b, h, q).
    r_mat = np.zeros((bhq, bsq), np.float32)
    r_mat[np.arange(bhq), b_idx * seq_q + q_idx] = 1.0

    # Cross-batch additive mask: 0 where the key row's batch matches, -1e30
    # otherwise (kills cross-batch score entries before the softmax).
    kb = np.repeat(np.arange(batch), seq_k)
    cross = np.where(b_idx[:, None] == kb[None, :], 0.0, -1e30).astype(np.float32)
    rmask_pack = np.stack([r_mat, cross])                             # (2, bhq, bsk)

    # One-hot head-lane selector per row.
    lane_head = np.repeat(np.arange(H), Dh)                           # (E,)
    hm_rows = (h_idx[:, None] == lane_head[None, :]).astype(np.float32)

    # G: sum the H masked context rows of (b, q) back into concat row (b, q).
    out_b = np.repeat(np.arange(batch), seq_q)
    out_q = np.tile(np.arange(seq_q), batch)
    g_mat = ((out_b[:, None] == b_idx[None, :])
             & (out_q[:, None] == q_idx[None, :])).astype(np.float32)  # (bsq, bhq)

    return dict(w_pack=jnp.asarray(w_pack),
                rmask_pack=jnp.asarray(rmask_pack),
                hm_rows=jnp.asarray(hm_rows),
                g_mat=jnp.asarray(g_mat))


# -------------------------------- wrapper -------------------------------------

def multi_head_attention(key, query, value, consts):
    """Pallas forward matching MultiHeadAttention.forward(key, query, value)."""
    B, Sk, E = key.shape
    Sq = query.shape[1]

    # Free contiguous reshapes; the kernel only ever sees 2-D lane-dense slabs.
    q_flat = query.reshape(B * Sq, E)
    k_flat = key.reshape(B * Sk, E)
    v_flat = value.reshape(B * Sk, E)

    vmem = lambda: pl.BlockSpec(memory_space=pltpu.MemorySpace.VMEM)
    out = pl.pallas_call(
        _mha_fused_kernel,
        out_shape=jax.ShapeDtypeStruct((B * Sq, E), jnp.float32),
        in_specs=[vmem() for _ in range(7)],
        out_specs=vmem(),
    )(q_flat, k_flat, v_flat,
      consts["w_pack"], consts["rmask_pack"], consts["hm_rows"], consts["g_mat"])
    return out.reshape(B, Sq, E)


# ----------------------------- pure-JAX reference ------------------------------

def mha_reference(key, query, value, params):
    B, Sk, E = key.shape
    Sq = query.shape[1]
    H, Dh = N_HEADS, E // N_HEADS
    kh = key.reshape(B, Sk, H, Dh)
    qh = query.reshape(B, Sq, H, Dh)
    vh = value.reshape(B, Sk, H, Dh)
    k = jnp.einsum("bshd,od->bsho", kh, params["wk"]).transpose(0, 2, 1, 3)
    q = jnp.einsum("bshd,od->bsho", qh, params["wq"]).transpose(0, 2, 1, 3)
    v = jnp.einsum("bshd,od->bsho", vh, params["wv"]).transpose(0, 2, 1, 3)
    product = jnp.einsum("bhqd,bhkd->bhqk", q, k) / math.sqrt(Dh)
    scores = jax.nn.softmax(product, axis=-1)
    out = jnp.einsum("bhqk,bhkd->bhqd", scores, v)
    concat = out.transpose(0, 2, 1, 3).reshape(B, Sq, H * Dh)
    return concat @ params["wo"].T + params["bo"]


# ------------------------------ parameter init ---------------------------------

def init_params(key):
    ks = jax.random.split(key, 5)
    b_h = 1.0 / math.sqrt(HEAD_DIM)
    b_e = 1.0 / math.sqrt(EMBED_DIM)
    return dict(
        wq=jax.random.uniform(ks[0], (HEAD_DIM, HEAD_DIM), jnp.float32, -b_h, b_h),
        wk=jax.random.uniform(ks[1], (HEAD_DIM, HEAD_DIM), jnp.float32, -b_h, b_h),
        wv=jax.random.uniform(ks[2], (HEAD_DIM, HEAD_DIM), jnp.float32, -b_h, b_h),
        wo=jax.random.uniform(ks[3], (EMBED_DIM, EMBED_DIM), jnp.float32, -b_e, b_e),
        bo=jax.random.uniform(ks[4], (EMBED_DIM,), jnp.float32, -b_e, b_e),
    )


# ----------------------------------- main ---------------------------------------

if __name__ == "__main__":
    root = jax.random.PRNGKey(0)
    kp_, kk, kq, kv = jax.random.split(root, 4)
    params = init_params(kp_)

    # One-time constant prep (hoisted out of the per-call path).
    consts = prepare_constants(params, BATCH, SEQ_LEN, SEQ_LEN)

    key_in = jax.random.normal(kk, (BATCH, SEQ_LEN, EMBED_DIM), jnp.float32)
    query_in = jax.random.normal(kq, (BATCH, SEQ_LEN, EMBED_DIM), jnp.float32)
    value_in = jax.random.normal(kv, (BATCH, SEQ_LEN, EMBED_DIM), jnp.float32)

    fwd = jax.jit(multi_head_attention)
    out = jax.block_until_ready(fwd(key_in, query_in, value_in, consts))

    assert out.shape == (BATCH, SEQ_LEN, EMBED_DIM), out.shape
    assert bool(jnp.all(jnp.isfinite(out)))

    ref = mha_reference(key_in, query_in, value_in, params)
    max_err = float(jnp.max(jnp.abs(out - ref)))
    assert bool(jnp.allclose(out, ref, atol=1e-2, rtol=1e-2)), max_err

    print("KERNEL_OK")
</pallas_src>

<mosaic_0001>
module attributes {stable_mosaic.version = 11 : i64} {
  func.func @_mha_fused_kernel(%arg0: memref<20x32xf32, #tpu.memory_space<vmem>>, %arg1: memref<20x32xf32, #tpu.memory_space<vmem>>, %arg2: memref<20x32xf32, #tpu.memory_space<vmem>>, %arg3: memref<5x32x32xf32, #tpu.memory_space<vmem>>, %arg4: memref<2x160x20xf32, #tpu.memory_space<vmem>>, %arg5: memref<160x32xf32, #tpu.memory_space<vmem>>, %arg6: memref<20x160xf32, #tpu.memory_space<vmem>>, %arg7: memref<20x32xf32, #tpu.memory_space<vmem>>) attributes {dimension_semantics = [], scalar_prefetch = 0 : i64, scratch_operands = 0 : i64, tpu.core_type = #tpu.core_type<tc>} {
    %c0 = arith.constant 0 : index
    %c0_0 = arith.constant 0 : index
    %0 = vector.load %arg0[%c0, %c0_0] : memref<20x32xf32, #tpu.memory_space<vmem>>, vector<20x32xf32>
    %c0_1 = arith.constant 0 : index
    %c0_2 = arith.constant 0 : index
    %c0_3 = arith.constant 0 : index
    %1 = vector.load %arg3[%c0_1, %c0_2, %c0_3] : memref<5x32x32xf32, #tpu.memory_space<vmem>>, vector<1x32x32xf32>
    %2 = vector.shape_cast %1 : vector<1x32x32xf32> to vector<32x32xf32>
    %cst = arith.constant dense<0.000000e+00> : vector<20x32xf32>
    %3 = tpu.matmul %0, %2, %cst {dimension_numbers = #tpu.dot_dimension_numbers<[1], [0], [0], [1], [0, 0, 1, 1], [], []>} : vector<20x32xf32>, vector<32x32xf32>, vector<20x32xf32> -> vector<20x32xf32>
    %c0_4 = arith.constant 0 : index
    %c0_5 = arith.constant 0 : index
    %4 = vector.load %arg1[%c0_4, %c0_5] : memref<20x32xf32, #tpu.memory_space<vmem>>, vector<20x32xf32>
    %c1 = arith.constant 1 : index
    %c0_6 = arith.constant 0 : index
    %c0_7 = arith.constant 0 : index
    %5 = vector.load %arg3[%c1, %c0_6, %c0_7] : memref<5x32x32xf32, #tpu.memory_space<vmem>>, vector<1x32x32xf32>
    %6 = vector.shape_cast %5 : vector<1x32x32xf32> to vector<32x32xf32>
    %cst_8 = arith.constant dense<0.000000e+00> : vector<20x32xf32>
    %7 = tpu.matmul %4, %6, %cst_8 {dimension_numbers = #tpu.dot_dimension_numbers<[1], [0], [0], [1], [0, 0, 1, 1], [], []>} : vector<20x32xf32>, vector<32x32xf32>, vector<20x32xf32> -> vector<20x32xf32>
    %c0_9 = arith.constant 0 : index
    %c0_10 = arith.constant 0 : index
    %8 = vector.load %arg2[%c0_9, %c0_10] : memref<20x32xf32, #tpu.memory_space<vmem>>, vector<20x32xf32>
    %c2 = arith.constant 2 : index
    %c0_11 = arith.constant 0 : index
    %c0_12 = arith.constant 0 : index
    %9 = vector.load %arg3[%c2, %c0_11, %c0_12] : memref<5x32x32xf32, #tpu.memory_space<vmem>>, vector<1x32x32xf32>
    %10 = vector.shape_cast %9 : vector<1x32x32xf32> to vector<32x32xf32>
    %cst_13 = arith.constant dense<0.000000e+00> : vector<20x32xf32>
    %11 = tpu.matmul %8, %10, %cst_13 {dimension_numbers = #tpu.dot_dimension_numbers<[1], [0], [0], [1], [0, 0, 1, 1], [], []>} : vector<20x32xf32>, vector<32x32xf32>, vector<20x32xf32> -> vector<20x32xf32>
    %c0_14 = arith.constant 0 : index
    %c0_15 = arith.constant 0 : index
    %12 = vector.load %arg5[%c0_14, %c0_15] : memref<160x32xf32, #tpu.memory_space<vmem>>, vector<160x32xf32>
    %c0_16 = arith.constant 0 : index
    %c0_17 = arith.constant 0 : index
    %c0_18 = arith.constant 0 : index
    %13 = vector.load %arg4[%c0_16, %c0_17, %c0_18] : memref<2x160x20xf32, #tpu.memory_space<vmem>>, vector<1x160x20xf32>
    %14 = vector.shape_cast %13 : vector<1x160x20xf32> to vector<160x20xf32>
    %cst_19 = arith.constant dense<0.000000e+00> : vector<160x32xf32>
    %15 = tpu.matmul %14, %3, %cst_19 {dimension_numbers = #tpu.dot_dimension_numbers<[1], [0], [0], [1], [0, 0, 1, 1], [], []>} : vector<160x20xf32>, vector<20x32xf32>, vector<160x32xf32> -> vector<160x32xf32>
    %16 = arith.mulf %15, %12 : vector<160x32xf32>
    %cst_20 = arith.constant dense<0.000000e+00> : vector<160x20xf32>
    %17 = tpu.matmul %16, %7, %cst_20 {dimension_numbers = #tpu.dot_dimension_numbers<[1], [1], [0], [0], [0, 0, 1, 0], [], []>} : vector<160x32xf32>, vector<20x32xf32>, vector<160x20xf32> -> vector<160x20xf32>
    %c1_21 = arith.constant 1 : index
    %c0_22 = arith.constant 0 : index
    %c0_23 = arith.constant 0 : index
    %18 = vector.load %arg4[%c1_21, %c0_22, %c0_23] : memref<2x160x20xf32, #tpu.memory_space<vmem>>, vector<1x160x20xf32>
    %19 = vector.shape_cast %18 : vector<1x160x20xf32> to vector<160x20xf32>
    %20 = arith.addf %17, %19 : vector<160x20xf32>
    %cst_24 = arith.constant dense<0xFF800000> : vector<160xf32>
    %21 = vector.multi_reduction <maximumf>, %20, %cst_24 [1] : vector<160x20xf32> to vector<160xf32>
    %22 = vector.shape_cast %21 : vector<160xf32> to vector<160x1xf32>
    %23 = vector.broadcast %22 : vector<160x1xf32> to vector<160x20xf32>
    %24 = arith.subf %20, %23 : vector<160x20xf32>
    %25 = math.exp %24 : vector<160x20xf32>
    %cst_25 = arith.constant dense<0.000000e+00> : vector<160xf32>
    %26 = vector.multi_reduction <add>, %25, %cst_25 [1] : vector<160x20xf32> to vector<160xf32>
    %27 = vector.shape_cast %26 : vector<160xf32> to vector<160x1xf32>
    %28 = tpu.reciprocal %27 {approx = true} : vector<160x1xf32> -> vector<160x1xf32>
    %29 = vector.broadcast %28 : vector<160x1xf32> to vector<160x20xf32>
    %30 = arith.mulf %25, %29 : vector<160x20xf32>
    %cst_26 = arith.constant dense<0.000000e+00> : vector<160x32xf32>
    %31 = tpu.matmul %30, %11, %cst_26 {dimension_numbers = #tpu.dot_dimension_numbers<[1], [0], [0], [1], [0, 0, 1, 1], [], []>} : vector<160x20xf32>, vector<20x32xf32>, vector<160x32xf32> -> vector<160x32xf32>
    %c0_27 = arith.constant 0 : index
    %c0_28 = arith.constant 0 : index
    %32 = vector.load %arg6[%c0_27, %c0_28] : memref<20x160xf32, #tpu.memory_space<vmem>>, vector<20x160xf32>
    %33 = arith.mulf %31, %12 : vector<160x32xf32>
    %cst_29 = arith.constant dense<0.000000e+00> : vector<20x32xf32>
    %34 = tpu.matmul %32, %33, %cst_29 {dimension_numbers = #tpu.dot_dimension_numbers<[1], [0], [0], [1], [0, 0, 1, 1], [], []>} : vector<20x160xf32>, vector<160x32xf32>, vector<20x32xf32> -> vector<20x32xf32>
    %c3 = arith.constant 3 : index
    %c0_30 = arith.constant 0 : index
    %c0_31 = arith.constant 0 : index
    %35 = vector.load %arg3[%c3, %c0_30, %c0_31] : memref<5x32x32xf32, #tpu.memory_space<vmem>>, vector<1x32x32xf32>
    %36 = vector.shape_cast %35 : vector<1x32x32xf32> to vector<32x32xf32>
    %cst_32 = arith.constant dense<0.000000e+00> : vector<20x32xf32>
    %37 = tpu.matmul %34, %36, %cst_32 {dimension_numbers = #tpu.dot_dimension_numbers<[1], [0], [0], [1], [0, 0, 1, 1], [], []>} : vector<20x32xf32>, vector<32x32xf32>, vector<20x32xf32> -> vector<20x32xf32>
    %c4 = arith.constant 4 : index
    %c0_33 = arith.constant 0 : index
    %c0_34 = arith.constant 0 : index
    %38 = vector.load %arg3[%c4, %c0_33, %c0_34] : memref<5x32x32xf32, #tpu.memory_space<vmem>>, vector<1x32x32xf32>
    %39 = vector.shape_cast %38 : vector<1x32x32xf32> to vector<32x32xf32>
    %40 = vector.extract_strided_slice %39 {offsets = [0, 0], sizes = [1, 32], strides = [1, 1]} : vector<32x32xf32> to vector<1x32xf32>
    %41 = vector.broadcast %40 : vector<1x32xf32> to vector<20x32xf32>
    %42 = arith.addf %37, %41 : vector<20x32xf32>
    %c0_35 = arith.constant 0 : index
    %c0_36 = arith.constant 0 : index
    %43 = vector.load %arg7[%c0_35, %c0_36] : memref<20x32xf32, #tpu.memory_space<vmem>>, vector<20x32xf32>
    tpu.vector_store %arg7[%c0_35, %c0_36], %42 {strides = array<i32>} : memref<20x32xf32, #tpu.memory_space<vmem>>, vector<20x32xf32>,
    return
  }
}

</mosaic_0001>

<bundles_post_ra>
// kernel: multi_head_attention.1
= control target key start
LH: loop header
LB: loop body
LE: loop exit
PB: predicated region body
PF: predicated region fallthrough
CT: control target
= control target key end

     0   :  { %v2001_v0 = vmov 0.0   ;;  %vm2002_vm0 = vmmov 0   ;;  %vm33_vm1 = vcmask 261120   ;;  %vm357_vm2 = vcmask 162816   ;;  %s2755_s3 = inlined_call_operand.vmem [shape: f32[5,32,32], index: 3, kind: input, shape index: {}]   ;;  %s2756_s0 = inlined_call_operand.vmem [shape: f32[20,32], index: 0, kind: input, shape index: {}]   ;;  %s2757_s1 = inlined_call_operand.vmem [shape: f32[20,32], index: 1, kind: input, shape index: {}]   ;;  %s2758_s4 = inlined_call_operand.vmem [shape: f32[2,160,20], index: 4, kind: input, shape index: {}]   ;;  %s2759_s2 = inlined_call_operand.vmem [shape: f32[20,32], index: 2, kind: input, shape index: {}]   ;;  %s2760_s5 = inlined_call_operand.vmem [shape: f32[160,32], index: 5, kind: input, shape index: {}]   ;;  %s2761_s6 = inlined_call_operand.vmem [shape: f32[20,160], index: 6, kind: input, shape index: {}]   ;;  %s2762_s7 = inlined_call_operand.vmem [shape: f32[20,32], index: 7, kind: output, shape index: {}]  }
   0x1   :  { %1743 = vmatprep.subr.mxu0 %v2001_v0  ;;  %v32_v1 = vld [vmem:[%s2755_s3 + $0x18] sm:$0xff]  ;;  %v31_v2 = vld [vmem:[%s2755_s3 + $0x10] sm:$0xff]  ;;  %1751 = vmatprep.mubr.msk.f32.mxu0 %vm2002_vm0, %v2001_v0  ;;  %v30_v3 = vld [vmem:[%s2755_s3 + $0x8] sm:$0xff]  ;;  %vm418_vm3 = vcmask 1043456   ;;  %vm1527_vm4 = vcmask 257024  }
   0x2   :  { %1744 = vmatpush3.msra.mxu0 %v32_v1  ;;  %1760 = vmatprep.subr.mxu1 %v2001_v0  ;;  %v1539_v4 = vld [vmem:[%s2755_s3 + $0x38] sm:$0xff]  ;;  %v1538_v5 = vld [vmem:[%s2755_s3 + $0x30] sm:$0xff]  ;;  %v29_v6 = vld [vmem:[%s2755_s3] sm:$0xff] }
   0x3   :  { %1745 = vmatprep.subr.mxu0 %v2001_v0  ;;  %1768 = vmatprep.mubr.msk.f32.mxu1 %vm2002_vm0, %v2001_v0  ;;  %v1537_v7 = vld [vmem:[%s2755_s3 + $0x28] sm:$0xff]  ;;  %v26_v8 = vld [vmem:[%s2756_s0] sm:$0xff]  ;;  %v28_v13 = vld [vmem:[%s2756_s0 + $0x10] sm:$0xf] }
   0x4   :  { %1746 = vmatpush3.msra.mxu0 %v31_v2  ;;  %1761 = vmatpush3.msra.mxu1 %v1539_v4  ;;  %v1536_v9 = vld [vmem:[%s2755_s3 + $0x20] sm:$0xff]  ;;  %v27_v11 = vld [vmem:[%s2756_s0 + $0x8] sm:$0xff]  ;;  %v125_v14 = vld [vmem:[%s2757_s1 + $0x10] sm:$0xf] }
   0x5   :  { %1747 = vmatprep.subr.mxu0 %v2001_v0  ;;  %1762 = vmatprep.subr.mxu1 %v2001_v0  ;;  %v123_v10 = vld [vmem:[%s2757_s1] sm:$0xff]  ;;  %v124_v12 = vld [vmem:[%s2757_s1 + $0x8] sm:$0xff]  ;;  %v1546_v16 = vld [vmem:[%s2755_s3 + $0x58] sm:$0xff] }
   0x6   :  { %1748 = vmatpush3.msra.mxu0 %v30_v3  ;;  %1763 = vmatpush3.msra.mxu1 %v1538_v5  ;;  %v337_v15 = vld [vmem:[%s2758_s4] sm:$0xff]  ;;  %v1545_v17 = vld [vmem:[%s2755_s3 + $0x50] sm:$0xff]  ;;  %v1544_v18 = vld [vmem:[%s2755_s3 + $0x48] sm:$0xff] }
   0x7   :  { %1749 = vmatprep.subr.mxu0 %v2001_v0  ;;  %1764 = vmatprep.subr.mxu1 %v2001_v0  ;;  %v1543_v19 = vld [vmem:[%s2755_s3 + $0x40] sm:$0xff]  ;;  %v221_v21 = vld [vmem:[%s2759_s2 + $0x8] sm:$0xff]  ;;  %v222_v22 = vld [vmem:[%s2759_s2 + $0x10] sm:$0xf] }
   0x8   :  { %1750 = vmatpush3.msra.mxu0 %v29_v6  ;;  %1765 = vmatpush3.msra.mxu1 %v1537_v7  ;;  %v220_v20 = vld [vmem:[%s2759_s2] sm:$0xff]  ;;  %v338_v34 = vld [vmem:[%s2758_s4 + $0x8] sm:$0xff]  ;;  %v339_v36 = vld [vmem:[%s2758_s4 + $0x10] sm:$0xff] }
   0x9   :  { %1752 = vmatmul.mubr.msk.f32.vlgmr.msra.gmra.mxu0 %vm33_vm1, %v26_v8  ;;  %1766 = vmatprep.subr.mxu1 %v2001_v0  ;;  %v340_v37 = vld [vmem:[%s2758_s4 + $0x18] sm:$0xff]  ;;  %v341_v38 = vld [vmem:[%s2758_s4 + $0x20] sm:$0xff]  ;;  %v342_v39 = vld [vmem:[%s2758_s4 + $0x28] sm:$0xff] }
   0xa   :  { %1754 = vmatprep.mubr.msk.f32.mxu0 %vm2002_vm0, %v2001_v0  ;;  %1767 = vmatpush3.msra.mxu1 %v1536_v9  ;;  %v343_v40 = vld [vmem:[%s2758_s4 + $0x30] sm:$0xff]  ;;  %v344_v41 = vld [vmem:[%s2758_s4 + $0x38] sm:$0xff]  ;;  %v345_v42 = vld [vmem:[%s2758_s4 + $0x40] sm:$0xff] }
   0xb   :  { %1769 = vmatmul.mubr.msk.f32.vlgmr.msra.gmra.mxu1 %vm33_vm1, %v123_v10  ;;  %1777 = vmatprep.subr.mxu0 %v2001_v0  ;;  %v346_v43 = vld [vmem:[%s2758_s4 + $0x48] sm:$0xff]  ;;  %v347_v44 = vld [vmem:[%s2758_s4 + $0x50] sm:$0xff]  ;;  %v348_v45 = vld [vmem:[%s2758_s4 + $0x58] sm:$0xff] }
   0xc   :  { %1771 = vmatprep.mubr.msk.f32.mxu1 %vm2002_vm0, %v2001_v0  ;;  %1778 = vmatpush3.msra.mxu0 %v1546_v16  ;;  %v349_v46 = vld [vmem:[%s2758_s4 + $0x60] sm:$0xff]  ;;  %v350_v47 = vld [vmem:[%s2758_s4 + $0x68] sm:$0xff]  ;;  %v351_v48 = vld [vmem:[%s2758_s4 + $0x70] sm:$0xff] }
   0xd   :  { %1755 = vmatmul.mubr.msk.f32.gmra.mxu0 %vm33_vm1, %v27_v11  ;;  %1779 = vmatprep.subr.mxu0 %v2001_v0  ;;  %v352_v49 = vld [vmem:[%s2758_s4 + $0x78] sm:$0xff]  ;;  %v353_v50 = vld [vmem:[%s2758_s4 + $0x80] sm:$0xff]  ;;  %v354_v51 = vld [vmem:[%s2758_s4 + $0x88] sm:$0xff] }
   0xe   :  { %1757 = vmatprep.mubr.msk.f32.mxu0 %vm2002_vm0, %v2001_v0  ;;  %1780 = vmatpush3.msra.mxu0 %v1545_v17  ;;  %v355_v52 = vld [vmem:[%s2758_s4 + $0x90] sm:$0xff]  ;;  %v356_v53 = vld [vmem:[%s2758_s4 + $0x98] sm:$0xff]  ;;  %v2239_v61 = vld [vmem:[%s2760_s5] sm:$0xff] }
   0xf   :  { %1772 = vmatmul.mubr.msk.f32.gmra.mxu1 %vm33_vm1, %v124_v12  ;;  %1781 = vmatprep.subr.mxu0 %v2001_v0  ;;  %v2244_v62 = vld [vmem:[%s2760_s5 + $0x8] sm:$0xff]  ;;  %v2251_v4 = vld [vmem:[%s2760_s5 + $0x10] sm:$0xff]  ;;  %v2256_v5 = vld [vmem:[%s2760_s5 + $0x18] sm:$0xff] }
  0x10   :  { %1774 = vmatprep.mubr.msk.f32.mxu1 %vm2002_vm0, %v2001_v0  ;;  %1782 = vmatpush3.msra.mxu0 %v1544_v18  ;;  %v2264_v8 = vld [vmem:[%s2760_s5 + $0x28] sm:$0xff]  ;;  %v2270_v11 = vld [vmem:[%s2760_s5 + $0x20] sm:$0xff]  ;;  %v2284_v17 = vld [vmem:[%s2760_s5 + $0x30] sm:$0xff] }
  0x11   :  { %1758 = vmatmul.mubr.msk.f32.gmra.mxu0 %vm33_vm1, %v28_v13  ;;  %1783 = vmatprep.subr.mxu0 %v2001_v0 }
  0x12   :  { %1785 = vmatprep.mubr.msk.f32.mxu0 %vm2002_vm0, %v2001_v0  ;;  %1784 = vmatpush3.msra.mxu0 %v1543_v19 }
  0x13   :  { %1775 = vmatmul.mubr.msk.f32.gmra.mxu1 %vm33_vm1, %v125_v14 }
  0x14   :  { %1800 = vmatprep.mubr.msk.f32.mxu1 %vm357_vm2, %v337_v15  ;;  %v2279_v15 = vld [vmem:[%s2760_s5 + $0x38] sm:$0xff] }
  0x15   :  { %1786 = vmatmul.mubr.msk.f32.vlgmr.msra.gmra.mxu0 %vm33_vm1, %v220_v20 }
  0x16   :  { %1788 = vmatprep.mubr.msk.f32.mxu0 %vm2002_vm0, %v2001_v0 }
  0x19   :  { %1789 = vmatmul.mubr.msk.f32.gmra.mxu0 %vm33_vm1, %v221_v21  ;;  %v2293_v21 = vld [vmem:[%s2760_s5 + $0x48] sm:$0xff] }
  0x1a   :  { %1791 = vmatprep.mubr.msk.f32.mxu0 %vm2002_vm0, %v2001_v0 }
  0x1d   :  { %1792 = vmatmul.mubr.msk.f32.gmra.mxu0 %vm33_vm1, %v222_v22 }
  0xc9   :  { %v109_v23 = vpop.f32.mrf.mxu0 }
  0xcb   :  { %v1753_v24 = vpop.f32.mrf.mxu0  ;;  %v206_v25 = vpop.f32.mrf.mxu1 }
  0xcd   :  { %v114_v26 = vpop.f32.mrf.mxu0  ;;  %v1770_v27 = vpop.f32.mrf.mxu1 }
  0xce   :  { %v2307_v27 = vld [vmem:[%s2760_s5 + $0x58] sm:$0xff] }
  0xcf   :  { %v1756_v28 = vpop.f32.mrf.mxu0  ;;  %v211_v29 = vpop.f32.mrf.mxu1 }
  0xd1   :  { %v119_v30 = vpop.f32.mrf.mxu0  ;;  %v1773_v31 = vpop.f32.mrf.mxu1 }
  0xd2   :  { %1794 = vmatprep.subr.msk.mxu1 %vm418_vm3, %v119_v30 }
  0xd3   :  { %v1759_v32 = vpop.f32.mrf.mxu0  ;;  %1795 = vmatpush3.msk.msra.mxu1 %vm418_vm3, %v119_v30  ;;  %v216_v33 = vpop.f32.mrf.mxu1 }
  0xd4   :  { %1796 = vmatprep.subr.mxu1 %v114_v26  ;;  %1830 = vmatprep.subr.msk.mxu0 %vm33_vm1, %v216_v33 }
  0xd5   :  { %1797 = vmatpush3.msra.mxu1 %v114_v26  ;;  %1831 = vmatpush3.xpose.msk.msra.mxu0 %vm33_vm1, %v216_v33  ;;  %v1776_v35 = vpop.f32.mrf.mxu1  ;;  %v303_v54 = vpop.f32.mrf.mxu0  ;;  %v2321_v33 = vld [vmem:[%s2760_s5 + $0x68] sm:$0xff] }
  0xd6   :  { %1798 = vmatprep.subr.mxu1 %v109_v23  ;;  %1832 = vmatprep.subr.msk.mxu0 %vm33_vm1, %v211_v29  ;;  %v2326_v35 = vld [vmem:[%s2760_s5 + $0x60] sm:$0xff] }
  0xd7   :  { %1799 = vmatpush3.msra.mxu1 %v109_v23  ;;  %v1787_v55 = vpop.f32.mrf.mxu0  ;;  %v2298_v23 = vld [vmem:[%s2760_s5 + $0x40] sm:$0xff] }
  0xd8   :  { %1801 = vmatmul.mubr.msk.f32.vlgmr.msra.gmra.mxu1 %vm357_vm2, %v338_v34 }
  0xd9   :  { %1803 = vmatprep.mubr.msk.f32.mxu1 %vm357_vm2, %v339_v36  ;;  %1833 = vmatpush3.xpose.msk.msra.mxu0 %vm33_vm1, %v211_v29  ;;  %v308_v56 = vpop.f32.mrf.mxu0  ;;  %v2312_v29 = vld [vmem:[%s2760_s5 + $0x50] sm:$0xff] }
  0xda   :  { %1834 = vmatprep.subr.msk.mxu0 %vm33_vm1, %v206_v25 }
  0xdb   :  { %v1790_v57 = vpop.f32.mrf.mxu0 }
  0xdc   :  { %1804 = vmatmul.mubr.msk.f32.gmra.mxu1 %vm357_vm2, %v340_v37 }
  0xdd   :  { %1806 = vmatprep.mubr.msk.f32.mxu1 %vm357_vm2, %v341_v38  ;;  %1835 = vmatpush3.xpose.msk.msra.mxu0 %vm33_vm1, %v206_v25  ;;  %v313_v58 = vpop.f32.mrf.mxu0 }
  0xde   :  { %1345 = vmatprep.subr.mxu0 %v2001_v0  ;;  %1866 = vmatprep.subr.msk.mxu1 %vm418_vm3, %v313_v58 }
  0xdf   :  { %1867 = vmatpush3.msk.msra.mxu1 %vm418_vm3, %v313_v58  ;;  %v1793_v59 = vpop.f32.mrf.mxu0  ;;  %v1571_v58 = vld [vmem:[%s2758_s4 + $0xa0] sm:$0xff] }
  0xe0   :  { %1807 = vmatmul.mubr.msk.f32.gmra.mxu1 %vm357_vm2, %v342_v39  ;;  %1868 = vmatprep.subr.mxu1 %v308_v56  ;;  %v2335_v39 = vld [vmem:[%s2760_s5 + $0x78] sm:$0xff]  ;;  %v1572_v59 = vld [vmem:[%s2758_s4 + $0xa8] sm:$0xff] }
  0xe1   :  { %1809 = vmatprep.mubr.msk.f32.mxu1 %vm357_vm2, %v343_v40  ;;  %1869 = vmatpush3.msra.mxu1 %v308_v56 }
  0xe2   :  { %1870 = vmatprep.subr.mxu1 %v303_v54 }
  0xe3   :  { %1871 = vmatpush3.msra.mxu1 %v303_v54 }
  0xe4   :  { %1810 = vmatmul.mubr.msk.f32.gmra.mxu1 %vm357_vm2, %v344_v41  ;;  %v2340_v41 = vld [vmem:[%s2760_s5 + $0x70] sm:$0xff] }
  0xe5   :  { %1812 = vmatprep.mubr.msk.f32.mxu1 %vm357_vm2, %v345_v42 }
  0xe8   :  { %1813 = vmatmul.mubr.msk.f32.gmra.mxu1 %vm357_vm2, %v346_v43 }
  0xe9   :  { %1815 = vmatprep.mubr.msk.f32.mxu1 %vm357_vm2, %v347_v44 }
  0xec   :  { %1816 = vmatmul.mubr.msk.f32.gmra.mxu1 %vm357_vm2, %v348_v45  ;;  %v2349_v45 = vld [vmem:[%s2760_s5 + $0x88] sm:$0xff] }
  0xed   :  { %1818 = vmatprep.mubr.msk.f32.mxu1 %vm357_vm2, %v349_v46 }
  0xf0   :  { %1819 = vmatmul.mubr.msk.f32.gmra.mxu1 %vm357_vm2, %v350_v47  ;;  %v2354_v47 = vld [vmem:[%s2760_s5 + $0x80] sm:$0xff] }
  0xf1   :  { %1821 = vmatprep.mubr.msk.f32.mxu1 %vm357_vm2, %v351_v48 }
  0xf4   :  { %1822 = vmatmul.mubr.msk.f32.gmra.mxu1 %vm357_vm2, %v352_v49 }
  0xf5   :  { %1824 = vmatprep.mubr.msk.f32.mxu1 %vm357_vm2, %v353_v50 }
  0xf8   :  { %1825 = vmatmul.mubr.msk.f32.gmra.mxu1 %vm357_vm2, %v354_v51  ;;  %v2363_v51 = vld [vmem:[%s2760_s5 + $0x98] sm:$0xff] }
  0xf9   :  { %1827 = vmatprep.mubr.msk.f32.mxu1 %vm357_vm2, %v355_v52 }
  0xfc   :  { %1828 = vmatmul.mubr.msk.f32.gmra.mxu1 %vm357_vm2, %v356_v53  ;;  %v2368_v53 = vld [vmem:[%s2760_s5 + $0x90] sm:$0xff] }
 0x198   :  { %v1802_v60 = vpop.f32.mrf.mxu1 }
 0x199   :  { %v588_v2 = vmul.f32 %v1802_v60, %v2244_v62 }
 0x19a   :  { %v488_v63 = vpop.f32.mrf.mxu1 }
 0x19b   :  { %v587_v1 = vmul.f32 %v488_v63, %v2239_v61 }
 0x19c   :  { %v1805_v3 = vpop.f32.mrf.mxu1 }
 0x19d   :  { %1836 = vmatprep.mubr.msk.f32.mxu0 %vm33_vm1, %v587_v1  ;;  %v590_v9 = vmul.f32 %v1805_v3, %v2256_v5 }
 0x19e   :  { %v498_v6 = vpop.f32.mrf.mxu1  ;;  %1837 = vmatmul.mubr.msk.f32.vlgmr.msra.gmra.mxu0 %vm33_vm1, %v588_v2  ;;  %v1573_v2 = vld [vmem:[%s2758_s4 + $0xb0] sm:$0xff] }
 0x19f   :  { %v589_v7 = vmul.f32 %v498_v6, %v2251_v4 }
 0x1a0   :  { %v1808_v10 = vpop.f32.mrf.mxu1 }
 0x1a1   :  { %1839 = vmatprep.mubr.msk.f32.mxu0 %vm33_vm1, %v589_v7  ;;  %v592_v12 = vmul.f32 %v1808_v10, %v2264_v8  ;;  %v1574_v7 = vld [vmem:[%s2758_s4 + $0xb8] sm:$0xff] }
 0x1a2   :  { %v508_v13 = vpop.f32.mrf.mxu1  ;;  %1840 = vmatmul.mubr.msk.f32.gmra.mxu0 %vm33_vm1, %v590_v9 }
 0x1a3   :  { %v591_v14 = vmul.f32 %v508_v13, %v2270_v11  ;;  %v1575_v13 = vld [vmem:[%s2758_s4 + $0xc0] sm:$0xff] }
 0x1a4   :  { %v1811_v16 = vpop.f32.mrf.mxu1 }
 0x1a5   :  { %1842 = vmatprep.mubr.msk.f32.mxu0 %vm33_vm1, %v591_v14  ;;  %v594_v18 = vmul.f32 %v1811_v16, %v2279_v15 }
 0x1a6   :  { %v518_v19 = vpop.f32.mrf.mxu1  ;;  %1843 = vmatmul.mubr.msk.f32.gmra.mxu0 %vm33_vm1, %v592_v12 }
 0x1a7   :  { %v593_v20 = vmul.f32 %v518_v19, %v2284_v17  ;;  %v1576_v19 = vld [vmem:[%s2758_s4 + $0xc8] sm:$0xff] }
 0x1a8   :  { %v1814_v22 = vpop.f32.mrf.mxu1 }
 0x1a9   :  { %1845 = vmatprep.mubr.msk.f32.mxu0 %vm33_vm1, %v593_v20  ;;  %v596_v24 = vmul.f32 %v1814_v22, %v2293_v21 }
 0x1aa   :  { %v528_v25 = vpop.f32.mrf.mxu1  ;;  %1846 = vmatmul.mubr.msk.f32.gmra.mxu0 %vm33_vm1, %v594_v18 }
 0x1ab   :  { %v595_v26 = vmul.f32 %v528_v25, %v2298_v23  ;;  %v1577_v25 = vld [vmem:[%s2758_s4 + $0xd0] sm:$0xff] }
 0x1ac   :  { %v1817_v28 = vpop.f32.mrf.mxu1 }
 0x1ad   :  { %1848 = vmatprep.mubr.msk.f32.mxu0 %vm33_vm1, %v595_v26  ;;  %v598_v30 = vmul.f32 %v1817_v28, %v2307_v27 }
 0x1ae   :  { %v538_v31 = vpop.f32.mrf.mxu1  ;;  %1849 = vmatmul.mubr.msk.f32.gmra.mxu0 %vm33_vm1, %v596_v24 }
 0x1af   :  { %v597_v32 = vmul.f32 %v538_v31, %v2312_v29  ;;  %v1578_v31 = vld [vmem:[%s2758_s4 + $0xd8] sm:$0xff] }
 0x1b0   :  { %v1820_v34 = vpop.f32.mrf.mxu1 }
 0x1b1   :  { %1851 = vmatprep.mubr.msk.f32.mxu0 %vm33_vm1, %v597_v32  ;;  %v600_v36 = vmul.f32 %v1820_v34, %v2321_v33 }
 0x1b2   :  { %v548_v37 = vpop.f32.mrf.mxu1  ;;  %1852 = vmatmul.mubr.msk.f32.gmra.mxu0 %vm33_vm1, %v598_v30 }
 0x1b3   :  { %v599_v38 = vmul.f32 %v548_v37, %v2326_v35  ;;  %v1579_v37 = vld [vmem:[%s2758_s4 + $0xe0] sm:$0xff] }
 0x1b4   :  { %v1823_v40 = vpop.f32.mrf.mxu1 }
 0x1b5   :  { %1854 = vmatprep.mubr.msk.f32.mxu0 %vm33_vm1, %v599_v38  ;;  %v602_v42 = vmul.f32 %v1823_v40, %v2335_v39 }
 0x1b6   :  { %v558_v43 = vpop.f32.mrf.mxu1  ;;  %1855 = vmatmul.mubr.msk.f32.gmra.mxu0 %vm33_vm1, %v600_v36 }
 0x1b7   :  { %v601_v44 = vmul.f32 %v558_v43, %v2340_v41  ;;  %v1580_v43 = vld [vmem:[%s2758_s4 + $0xe8] sm:$0xff] }
 0x1b8   :  { %v1826_v46 = vpop.f32.mrf.mxu1 }
 0x1b9   :  { %1857 = vmatprep.mubr.msk.f32.mxu0 %vm33_vm1, %v601_v44  ;;  %v604_v48 = vmul.f32 %v1826_v46, %v2349_v45 }
 0x1ba   :  { %v568_v49 = vpop.f32.mrf.mxu1  ;;  %1858 = vmatmul.mubr.msk.f32.gmra.mxu0 %vm33_vm1, %v602_v42 }
 0x1bb   :  { %v603_v50 = vmul.f32 %v568_v49, %v2354_v47  ;;  %v1581_v49 = vld [vmem:[%s2758_s4 + $0xf0] sm:$0xff] }
 0x1bc   :  { %v1829_v52 = vpop.f32.mrf.mxu1 }
 0x1bd   :  { %1860 = vmatprep.mubr.msk.f32.mxu0 %vm33_vm1, %v603_v50  ;;  %v606_v54 = vmul.f32 %v1829_v52, %v2363_v51 }
 0x1be   :  { %v578_v55 = vpop.f32.mrf.mxu1  ;;  %1861 = vmatmul.mubr.msk.f32.gmra.mxu0 %vm33_vm1, %v604_v48 }
 0x1bf   :  { %v605_v56 = vmul.f32 %v578_v55, %v2368_v53  ;;  %v1582_v55 = vld [vmem:[%s2758_s4 + $0xf8] sm:$0xff] }
 0x1c1   :  { %1863 = vmatprep.mubr.msk.f32.mxu0 %vm33_vm1, %v605_v56 }
 0x1c2   :  { %1864 = vmatmul.mubr.msk.f32.gmra.mxu0 %vm33_vm1, %v606_v54 }
 0x25e   :  { %v1838_v57 = vpop.f32.mrf.mxu0 }
 0x25f   :  { %v2387_v3 = vadd.f32 %v1838_v57, %v1572_v59  ;;  %v1583_v59 = vld [vmem:[%s2758_s4 + $0x100] sm:$0xff] }
 0x260   :  { %v763_v60 = vpop.f32.mrf.mxu0 }
 0x261   :  { %v2382_v63 = vadd.f32 %v1571_v58, %v763_v60  ;;  %v865_v18 = vsel %vm357_vm2, %v2387_v3, -inf }
 0x262   :  { %v1841_v1 = vpop.f32.mrf.mxu0 }
 0x263   :  { %v862_v6 = vsel %vm357_vm2, %v2382_v63, -inf  ;;  %v2399_v14 = vadd.f32 %v1841_v1, %v1574_v7 }
 0x264   :  { %v773_v9 = vpop.f32.mrf.mxu0  ;;  %863 = vmax.xlane.f32.xlu0 %v862_v6  ;;  %v1584_v6 = vld [vmem:[%s2758_s4 + $0x108] sm:$0xff] }
 0x265   :  { %v2394_v10 = vadd.f32 %v1573_v2, %v773_v9  ;;  %v871_v28 = vsel %vm357_vm2, %v2399_v14, -inf }
 0x266   :  { %v1844_v12 = vpop.f32.mrf.mxu0 }
 0x267   :  { %v868_v16 = vsel %vm357_vm2, %v2394_v10, -inf  ;;  %v2413_v26 = vadd.f32 %v1844_v12, %v1576_v19 }
 0x268   :  { %v783_v20 = vpop.f32.mrf.mxu0  ;;  %869 = vmax.xlane.f32.xlu1 %v868_v16  ;;  %866 = vmax.xlane.f32.xlu0 %v865_v18 }
 0x269   :  { %v2408_v22 = vadd.f32 %v1575_v13, %v783_v20  ;;  %v877_v40 = vsel %vm357_vm2, %v2413_v26, -inf  ;;  %v1585_v13 = vld [vmem:[%s2758_s4 + $0x110] sm:$0xff]  ;;  %v1586_v20 = vld [vmem:[%s2758_s4 + $0x118] sm:$0xff] }
 0x26a   :  { %v1847_v24 = vpop.f32.mrf.mxu0 }
 0x26b   :  { %v874_v30 = vsel %vm357_vm2, %v2408_v22, -inf  ;;  %v2427_v38 = vadd.f32 %v1847_v24, %v1578_v31  ;;  %v1587_v31 = vld [vmem:[%s2758_s4 + $0x120] sm:$0xff] }
 0x26c   :  { %v793_v32 = vpop.f32.mrf.mxu0  ;;  %872 = vmax.xlane.f32.xlu1 %v871_v28  ;;  %875 = vmax.xlane.f32.xlu0 %v874_v30  ;;  %v1588_v28 = vld [vmem:[%s2758_s4 + $0x128] sm:$0xff] }
 0x26d   :  { %v2422_v34 = vadd.f32 %v1577_v25, %v793_v32  ;;  %v883_v52 = vsel %vm357_vm2, %v2427_v38, -inf }
 0x26e   :  { %v1850_v36 = vpop.f32.mrf.mxu0 }
 0x26f   :  { %v880_v42 = vsel %vm357_vm2, %v2422_v34, -inf  ;;  %v2441_v50 = vadd.f32 %v1850_v36, %v1580_v43 }
 0x270   :  { %v803_v44 = vpop.f32.mrf.mxu0  ;;  %878 = vmax.xlane.f32.xlu1 %v877_v40  ;;  %881 = vmax.xlane.f32.xlu0 %v880_v42 }
 0x271   :  { %v2436_v46 = vadd.f32 %v1579_v37, %v803_v44  ;;  %v889_v1 = vsel %vm357_vm2, %v2441_v50, -inf  ;;  %v1590_v44 = vld [vmem:[%s2758_s4 + $0x138] sm:$0xff] }
 0x272   :  { %v1853_v48 = vpop.f32.mrf.mxu0 }
 0x273   :  { %v886_v54 = vsel %vm357_vm2, %v2436_v46, -inf  ;;  %v2455_v60 = vadd.f32 %v1853_v48, %v1582_v55 }
 0x274   :  { %v813_v56 = vpop.f32.mrf.mxu0  ;;  %884 = vmax.xlane.f32.xlu1 %v883_v52  ;;  %887 = vmax.xlane.f32.xlu0 %v886_v54 }
 0x275   :  { %v2450_v57 = vadd.f32 %v1581_v49, %v813_v56  ;;  %v895_v18 = vsel %vm357_vm2, %v2455_v60, -inf  ;;  %v1589_v49 = vld [vmem:[%s2758_s4 + $0x130] sm:$0xff] }
 0x276   :  { %v1856_v58 = vpop.f32.mrf.mxu0 }
 0x277   :  { %v892_v2 = vsel %vm357_vm2, %v2450_v57, -inf  ;;  %v2469_v16 = vadd.f32 %v1856_v58, %v1584_v6 }
 0x278   :  { %v823_v7 = vpop.f32.mrf.mxu0  ;;  %890 = vmax.xlane.f32.xlu1 %v889_v1  ;;  %893 = vmax.xlane.f32.xlu0 %v892_v2 }
 0x279   :  { %v2464_v9 = vadd.f32 %v1583_v59, %v823_v7  ;;  %v901_v36 = vsel %vm357_vm2, %v2469_v16, -inf }
 0x27a   :  { %v1859_v12 = vpop.f32.mrf.mxu0 }
 0x27b   :  { %v898_v19 = vsel %vm357_vm2, %v2464_v9, -inf  ;;  %v2486_v32 = vadd.f32 %v1859_v12, %v1586_v20 }
 0x27c   :  { %v833_v24 = vpop.f32.mrf.mxu0  ;;  %896 = vmax.xlane.f32.xlu1 %v895_v18  ;;  %899 = vmax.xlane.f32.xlu0 %v898_v19 }
 0x27d   :  { %v2478_v25 = vadd.f32 %v1585_v13, %v833_v24  ;;  %v907_v52 = vsel %vm357_vm2, %v2486_v32, -inf }
 0x27e   :  { %v1862_v30 = vpop.f32.mrf.mxu0 }
 0x27f   :  { %v904_v37 = vsel %vm357_vm2, %v2478_v25, -inf  ;;  %v2492_v42 = vadd.f32 %v1862_v30, %v1588_v28 }
 0x280   :  { %v843_v40 = vpop.f32.mrf.mxu0  ;;  %902 = vmax.xlane.f32.xlu1 %v901_v36  ;;  %905 = vmax.xlane.f32.xlu0 %v904_v37 }
 0x281   :  { %v2494_v43 = vadd.f32 %v1587_v31, %v843_v40  ;;  %v913_v59 = vsel %vm357_vm2, %v2492_v42, -inf }
 0x282   :  { %v1865_v48 = vpop.f32.mrf.mxu0 }
 0x283   :  { %v910_v54 = vsel %vm357_vm2, %v2494_v43, -inf  ;;  %v2506_v56 = vadd.f32 %v1865_v48, %v1590_v44 }
 0x284   :  { %v853_v55 = vpop.f32.mrf.mxu0  ;;  %908 = vmax.xlane.f32.xlu1 %v907_v52  ;;  %911 = vmax.xlane.f32.xlu0 %v910_v54 }
 0x285   :  { %v2508_v58 = vadd.f32 %v1589_v49, %v853_v55  ;;  %v919_v2 = vsel %vm357_vm2, %v2506_v56, -inf }
 0x287   :  { %v916_v1 = vsel %vm357_vm2, %v2508_v58, -inf }
 0x288   :  { %914 = vmax.xlane.f32.xlu1 %v913_v59  ;;  %917 = vmax.xlane.f32.xlu0 %v916_v1 }
 0x28c   :  { %920 = vmax.xlane.f32.xlu1 %v919_v2 }
 0x2ed   :  { %v864_v6 = vpop.xlane.xlu0 %863 }
 0x2ee   :  { %v922_v7 = vsub.f32 %v2382_v63, %v864_v6 }
 0x2f0   :  { %v942_v12 = vmul.f32 1.442695, %v922_v7 }
 0x2f1   :  { %v870_v13 = vpop.xlane.xlu1 %869  ;;  %v867_v18 = vpop.xlane.xlu0 %866 }
 0x2f2   :  { %1921 = vpow2.f32 %v942_v12  ;;  %v924_v19 = vsub.f32 %v2394_v10, %v870_v13  ;;  %v923_v20 = vsub.f32 %v2387_v3, %v867_v18 }
 0x2f4   :  { %v946_v24 = vmul.f32 1.442695, %v924_v19  ;;  %v944_v28 = vmul.f32 1.442695, %v923_v20 }
 0x2f5   :  { %v873_v30 = vpop.xlane.xlu1 %872  ;;  %v876_v31 = vpop.xlane.xlu0 %875 }
 0x2f6   :  { %1923 = vpow2.f32 %v946_v24  ;;  %v925_v36 = vsub.f32 %v2399_v14, %v873_v30  ;;  %v926_v37 = vsub.f32 %v2408_v22, %v876_v31 }
 0x2f7   :  { %1925 = vpow2.f32 %v944_v28 }
 0x2f8   :  { %v948_v40 = vmul.f32 1.442695, %v925_v36  ;;  %v950_v63 = vmul.f32 1.442695, %v926_v37 }
 0x2f9   :  { %v879_v44 = vpop.xlane.xlu1 %878  ;;  %v882_v48 = vpop.xlane.xlu0 %881 }
 0x2fa   :  { %1927 = vpow2.f32 %v948_v40  ;;  %v927_v49 = vsub.f32 %v2413_v26, %v879_v44  ;;  %v928_v10 = vsub.f32 %v2422_v34, %v882_v48 }
 0x2fb   :  { %1929 = vpow2.f32 %v950_v63 }
 0x2fc   :  { %v952_v3 = vmul.f32 1.442695, %v927_v49  ;;  %v954_v52 = vmul.f32 1.442695, %v928_v10 }
 0x2fd   :  { %v885_v54 = vpop.xlane.xlu1 %884  ;;  %v888_v55 = vpop.xlane.xlu0 %887 }
 0x2fe   :  { %1931 = vpow2.f32 %v952_v3  ;;  %v929_v14 = vsub.f32 %v2427_v38, %v885_v54  ;;  %v930_v22 = vsub.f32 %v2436_v46, %v888_v55 }
 0x2ff   :  { %v2525_v59 = vpop.eup %1921  ;;  %1933 = vpow2.f32 %v954_v52 }
 0x300   :  { %v956_v1 = vmul.f32 1.442695, %v929_v14  ;;  %v958_v2 = vmul.f32 1.442695, %v930_v22  ;;  %v982_v26 = vsel %vm357_vm2, %v2525_v59, 0.0 }
 0x301   :  { %v891_v6 = vpop.xlane.xlu1 %890  ;;  %983 = vadd.xlane.f32.xlu0 %v982_v26  ;;  %v894_v34 = vpop.xlane.xlu0 %893 }
 0x302   :  { %1935 = vpow2.f32 %v956_v1  ;;  %v931_v7 = vsub.f32 %v2441_v50, %v891_v6  ;;  %v932_v12 = vsub.f32 %v2450_v57, %v894_v34 }
 0x303   :  { %v2531_v13 = vpop.eup %1923  ;;  %1937 = vpow2.f32 %v958_v2 }
 0x304   :  { %v2533_v38 = vpop.eup %1925  ;;  %v960_v46 = vmul.f32 1.442695, %v931_v7  ;;  %v962_v18 = vmul.f32 1.442695, %v932_v12  ;;  %v988_v19 = vsel %vm357_vm2, %v2531_v13, 0.0 }
 0x305   :  { %v897_v20 = vpop.xlane.xlu1 %896  ;;  %989 = vadd.xlane.f32.xlu0 %v988_v19  ;;  %v985_v24 = vsel %vm357_vm2, %v2533_v38, 0.0  ;;  %v900_v28 = vpop.xlane.xlu0 %899 }
 0x306   :  { %1939 = vpow2.f32 %v960_v46  ;;  %v933_v50 = vsub.f32 %v2455_v60, %v897_v20  ;;  %986 = vadd.xlane.f32.xlu1 %v985_v24  ;;  %v934_v57 = vsub.f32 %v2464_v9, %v900_v28 }
 0x307   :  { %v2541_v30 = vpop.eup %1927  ;;  %1941 = vpow2.f32 %v962_v18 }
 0x308   :  { %v2543_v31 = vpop.eup %1929  ;;  %v964_v36 = vmul.f32 1.442695, %v933_v50  ;;  %v966_v37 = vmul.f32 1.442695, %v934_v57  ;;  %v991_v40 = vsel %vm357_vm2, %v2541_v30, 0.0 }
 0x309   :  { %v903_v63 = vpop.xlane.xlu1 %902  ;;  %v994_v44 = vsel %vm357_vm2, %v2543_v31, 0.0  ;;  %v906_v48 = vpop.xlane.xlu0 %905 }
 0x30a   :  { %1943 = vpow2.f32 %v964_v36  ;;  %v935_v60 = vsub.f32 %v2469_v16, %v903_v63  ;;  %992 = vadd.xlane.f32.xlu1 %v991_v40  ;;  %995 = vadd.xlane.f32.xlu0 %v994_v44  ;;  %v936_v9 = vsub.f32 %v2478_v25, %v906_v48 }
 0x30b   :  { %v2551_v49 = vpop.eup %1931  ;;  %1945 = vpow2.f32 %v966_v37 }
 0x30c   :  { %v2553_v10 = vpop.eup %1933  ;;  %v968_v3 = vmul.f32 1.442695, %v935_v60  ;;  %v970_v52 = vmul.f32 1.442695, %v936_v9  ;;  %v997_v54 = vsel %vm357_vm2, %v2551_v49, 0.0 }
 0x30d   :  { %v909_v55 = vpop.xlane.xlu1 %908  ;;  %v1000_v14 = vsel %vm357_vm2, %v2553_v10, 0.0  ;;  %v912_v22 = vpop.xlane.xlu0 %911 }
 0x30e   :  { %1947 = vpow2.f32 %v968_v3  ;;  %v937_v16 = vsub.f32 %v2486_v32, %v909_v55  ;;  %998 = vadd.xlane.f32.xlu1 %v997_v54  ;;  %1001 = vadd.xlane.f32.xlu0 %v1000_v14  ;;  %v938_v25 = vsub.f32 %v2494_v43, %v912_v22 }
 0x30f   :  { %v2561_v1 = vpop.eup %1935  ;;  %1949 = vpow2.f32 %v970_v52 }
 0x310   :  { %v2563_v2 = vpop.eup %1937  ;;  %v972_v26 = vmul.f32 1.442695, %v937_v16  ;;  %v974_v6 = vmul.f32 1.442695, %v938_v25  ;;  %v1003_v34 = vsel %vm357_vm2, %v2561_v1, 0.0 }
 0x311   :  { %v915_v7 = vpop.xlane.xlu1 %914  ;;  %v1006_v12 = vsel %vm357_vm2, %v2563_v2, 0.0  ;;  %v918_v46 = vpop.xlane.xlu0 %917 }
 0x312   :  { %1951 = vpow2.f32 %v972_v26  ;;  %v939_v32 = vsub.f32 %v2492_v42, %v915_v7  ;;  %1004 = vadd.xlane.f32.xlu1 %v1003_v34  ;;  %1007 = vadd.xlane.f32.xlu0 %v1006_v12  ;;  %v940_v43 = vsub.f32 %v2508_v58, %v918_v46 }
 0x313   :  { %v2571_v18 = vpop.eup %1939  ;;  %1953 = vpow2.f32 %v974_v6 }
 0x314   :  { %v2573_v19 = vpop.eup %1941  ;;  %v976_v20 = vmul.f32 1.442695, %v939_v32  ;;  %v978_v24 = vmul.f32 1.442695, %v940_v43  ;;  %v1009_v28 = vsel %vm357_vm2, %v2571_v18, 0.0 }
 0x315   :  { %v921_v50 = vpop.xlane.xlu1 %920  ;;  %v1012_v57 = vsel %vm357_vm2, %v2573_v19, 0.0 }
 0x316   :  { %1955 = vpow2.f32 %v976_v20  ;;  %v941_v42 = vsub.f32 %v2506_v56, %v921_v50  ;;  %1010 = vadd.xlane.f32.xlu1 %v1009_v28  ;;  %1013 = vadd.xlane.f32.xlu0 %v1012_v57 }
 0x317   :  { %v2580_v58 = vpop.eup %1943  ;;  %1957 = vpow2.f32 %v978_v24 }
 0x318   :  { %v2582_v36 = vpop.eup %1945  ;;  %v980_v37 = vmul.f32 1.442695, %v941_v42  ;;  %v1015_v40 = vsel %vm357_vm2, %v2580_v58, 0.0 }
 0x319   :  { %v1018_v63 = vsel %vm357_vm2, %v2582_v36, 0.0 }
 0x31a   :  { %1959 = vpow2.f32 %v980_v37  ;;  %1016 = vadd.xlane.f32.xlu1 %v1015_v40  ;;  %1019 = vadd.xlane.f32.xlu0 %v1018_v63 }
 0x31b   :  { %v2588_v44 = vpop.eup %1947 }
 0x31c   :  { %v2590_v56 = vpop.eup %1949  ;;  %v1021_v48 = vsel %vm357_vm2, %v2588_v44, 0.0 }
 0x31d   :  { %v1024_v60 = vsel %vm357_vm2, %v2590_v56, 0.0 }
 0x31e   :  { %1022 = vadd.xlane.f32.xlu1 %v1021_v48  ;;  %1025 = vadd.xlane.f32.xlu0 %v1024_v60 }
 0x31f   :  { %v2596_v9 = vpop.eup %1951 }
 0x320   :  { %v2598_v3 = vpop.eup %1953  ;;  %v1027_v52 = vsel %vm357_vm2, %v2596_v9, 0.0 }
 0x321   :  { %v1030_v54 = vsel %vm357_vm2, %v2598_v3, 0.0 }
 0x322   :  { %1028 = vadd.xlane.f32.xlu1 %v1027_v52  ;;  %1031 = vadd.xlane.f32.xlu0 %v1030_v54 }
 0x323   :  { %v2604_v55 = vpop.eup %1955 }
 0x324   :  { %v2606_v14 = vpop.eup %1957  ;;  %v1033_v22 = vsel %vm357_vm2, %v2604_v55, 0.0 }
 0x325   :  { %v1036_v16 = vsel %vm357_vm2, %v2606_v14, 0.0 }
 0x326   :  { %1034 = vadd.xlane.f32.xlu1 %v1033_v22  ;;  %1037 = vadd.xlane.f32.xlu0 %v1036_v16 }
 0x327   :  { %v2612_v25 = vpop.eup %1959 }
 0x328   :  { %v1039_v26 = vsel %vm357_vm2, %v2612_v25, 0.0 }
 0x32a   :  { %1040 = vadd.xlane.f32.xlu1 %v1039_v26 }
 0x38a   :  { %v984_v6 = vpop.xlane.xlu0 %983 }
 0x38b   :  { %1961 = vrcp.f32 %v984_v6 }
 0x38e   :  { %v990_v34 = vpop.xlane.xlu0 %989 }
 0x38f   :  { %v987_v7 = vpop.xlane.xlu1 %986  ;;  %1963 = vrcp.f32 %v990_v34 }
 0x390   :  { %1965 = vrcp.f32 %v987_v7 }
 0x393   :  { %v993_v12 = vpop.xlane.xlu1 %992  ;;  %v996_v46 = vpop.xlane.xlu0 %995 }
 0x394   :  { %1967 = vrcp.f32 %v993_v12 }
 0x395   :  { %1969 = vrcp.f32 %v996_v46 }
 0x397   :  { %v999_v32 = vpop.xlane.xlu1 %998  ;;  %v1002_v43 = vpop.xlane.xlu0 %1001 }
 0x398   :  { %v1962_v20 = vpop.eup %1961  ;;  %1971 = vrcp.f32 %v999_v32 }
 0x399   :  { %1973 = vrcp.f32 %v1002_v43  ;;  %v1062_v24 = vmul.f32 %v1962_v20, %v2525_v59 }
 0x39b   :  { %v1005_v28 = vpop.xlane.xlu1 %1004  ;;  %v1008_v50 = vpop.xlane.xlu0 %1007  ;;  %1872 = vmatprep.mubr.msk.f32.mxu1 %vm357_vm2, %v1062_v24 }
 0x39c   :  { %v1964_v57 = vpop.eup %1963  ;;  %1975 = vrcp.f32 %v1005_v28 }
 0x39d   :  { %v1966_v42 = vpop.eup %1965  ;;  %1977 = vrcp.f32 %v1008_v50  ;;  %v1064_v37 = vmul.f32 %v1964_v57, %v2531_v13 }
 0x39e   :  { %v1063_v40 = vmul.f32 %v1966_v42, %v2533_v38 }
 0x39f   :  { %v1011_v63 = vpop.xlane.xlu1 %1010  ;;  %v1014_v48 = vpop.xlane.xlu0 %1013 }
 0x3a0   :  { %1979 = vrcp.f32 %v1011_v63  ;;  %1873 = vmatmul.mubr.msk.f32.vlgmr.msra.gmra.mxu1 %vm357_vm2, %v1063_v40 }
 0x3a1   :  { %v1968_v60 = vpop.eup %1967  ;;  %1981 = vrcp.f32 %v1014_v48  ;;  %1875 = vmatprep.mubr.msk.f32.mxu1 %vm357_vm2, %v1064_v37 }
 0x3a2   :  { %v1970_v59 = vpop.eup %1969  ;;  %v1065_v52 = vmul.f32 %v1968_v60, %v2541_v30 }
 0x3a3   :  { %v1017_v54 = vpop.xlane.xlu1 %1016  ;;  %v1020_v22 = vpop.xlane.xlu0 %1019  ;;  %v1066_v16 = vmul.f32 %v1970_v59, %v2543_v31 }
 0x3a4   :  { %1983 = vrcp.f32 %v1017_v54  ;;  %1876 = vmatmul.mubr.msk.f32.gmra.mxu1 %vm357_vm2, %v1065_v52 }
 0x3a5   :  { %v1972_v13 = vpop.eup %1971  ;;  %1985 = vrcp.f32 %v1020_v22  ;;  %1878 = vmatprep.mubr.msk.f32.mxu1 %vm357_vm2, %v1066_v16 }
 0x3a6   :  { %v1974_v38 = vpop.eup %1973  ;;  %v1067_v26 = vmul.f32 %v1972_v13, %v2551_v49 }
 0x3a7   :  { %v1023_v6 = vpop.xlane.xlu1 %1022  ;;  %v1026_v34 = vpop.xlane.xlu0 %1025  ;;  %v1068_v7 = vmul.f32 %v1974_v38, %v2553_v10 }
 0x3a8   :  { %1987 = vrcp.f32 %v1023_v6  ;;  %1879 = vmatmul.mubr.msk.f32.gmra.mxu1 %vm357_vm2, %v1067_v26 }
 0x3a9   :  { %v1976_v30 = vpop.eup %1975  ;;  %1989 = vrcp.f32 %v1026_v34  ;;  %1881 = vmatprep.mubr.msk.f32.mxu1 %vm357_vm2, %v1068_v7 }
 0x3aa   :  { %v1978_v31 = vpop.eup %1977  ;;  %v1069_v12 = vmul.f32 %v1976_v30, %v2561_v1 }
 0x3ab   :  { %v1029_v46 = vpop.xlane.xlu1 %1028  ;;  %v1032_v32 = vpop.xlane.xlu0 %1031  ;;  %v1070_v43 = vmul.f32 %v1978_v31, %v2563_v2 }
 0x3ac   :  { %1991 = vrcp.f32 %v1029_v46  ;;  %1882 = vmatmul.mubr.msk.f32.gmra.mxu1 %vm357_vm2, %v1069_v12 }
 0x3ad   :  { %v1980_v49 = vpop.eup %1979  ;;  %1993 = vrcp.f32 %v1032_v32  ;;  %1884 = vmatprep.mubr.msk.f32.mxu1 %vm357_vm2, %v1070_v43 }
 0x3ae   :  { %v1982_v10 = vpop.eup %1981  ;;  %v1071_v20 = vmul.f32 %v1980_v49, %v2571_v18 }
 0x3af   :  { %v1035_v24 = vpop.xlane.xlu1 %1034  ;;  %v1038_v28 = vpop.xlane.xlu0 %1037  ;;  %v1072_v50 = vmul.f32 %v1982_v10, %v2573_v19 }
 0x3b0   :  { %1995 = vrcp.f32 %v1035_v24  ;;  %1885 = vmatmul.mubr.msk.f32.gmra.mxu1 %vm357_vm2, %v1071_v20 }
 0x3b1   :  { %v1984_v1 = vpop.eup %1983  ;;  %1997 = vrcp.f32 %v1038_v28  ;;  %1887 = vmatprep.mubr.msk.f32.mxu1 %vm357_vm2, %v1072_v50 }
 0x3b2   :  { %v1986_v2 = vpop.eup %1985  ;;  %v1073_v57 = vmul.f32 %v1984_v1, %v2580_v58 }
 0x3b3   :  { %v1041_v42 = vpop.xlane.xlu1 %1040  ;;  %v1074_v37 = vmul.f32 %v1986_v2, %v2582_v36  ;;  %v1312_v2 = vld [vmem:[%s2761_s6 + $0x10] sm:$0xff] }
 0x3b4   :  { %1999 = vrcp.f32 %v1041_v42  ;;  %1888 = vmatmul.mubr.msk.f32.gmra.mxu1 %vm357_vm2, %v1073_v57  ;;  %v1315_v57 = vld [vmem:[%s2761_s6 + $0x28] sm:$0xf] }
 0x3b5   :  { %v1988_v18 = vpop.eup %1987  ;;  %1890 = vmatprep.mubr.msk.f32.mxu1 %vm357_vm2, %v1074_v37  ;;  %v1639_v42 = vld [vmem:[%s2755_s3 + $0x68] sm:$0xff]  ;;  %v1314_v37 = vld [vmem:[%s2761_s6 + $0x20] sm:$0xf] }
 0x3b6   :  { %v1990_v19 = vpop.eup %1989  ;;  %v1075_v40 = vmul.f32 %v1988_v18, %v2588_v44  ;;  %v1638_v18 = vld [vmem:[%s2755_s3 + $0x60] sm:$0xff] }
 0x3b7   :  { %v1076_v63 = vmul.f32 %v1990_v19, %v2590_v56 }
 0x3b8   :  { %1891 = vmatmul.mubr.msk.f32.gmra.mxu1 %vm357_vm2, %v1075_v40 }
 0x3b9   :  { %v1992_v48 = vpop.eup %1991  ;;  %1893 = vmatprep.mubr.msk.f32.mxu1 %vm357_vm2, %v1076_v63 }
 0x3ba   :  { %v1994_v58 = vpop.eup %1993  ;;  %v1077_v60 = vmul.f32 %v1992_v48, %v2596_v9  ;;  %v1311_v9 = vld [vmem:[%s2761_s6 + $0x8] sm:$0xff] }
 0x3bb   :  { %v1078_v36 = vmul.f32 %v1994_v58, %v2598_v3  ;;  %1635 = vmatprep.mubr.msk.f32.mxu0 %vm33_vm1, %v1311_v9 }
 0x3bc   :  { %1894 = vmatmul.mubr.msk.f32.gmra.mxu1 %vm357_vm2, %v1077_v60 }
 0x3bd   :  { %v1996_v59 = vpop.eup %1995  ;;  %1896 = vmatprep.mubr.msk.f32.mxu1 %vm357_vm2, %v1078_v36  ;;  %v1432_v36 = vlaneseq }
 0x3be   :  { %v1998_v52 = vpop.eup %1997  ;;  %v1079_v44 = vmul.f32 %v1996_v59, %v2604_v55 }
 0x3bf   :  { %v1080_v56 = vmul.f32 %v1998_v52, %v2606_v14  ;;  %v1433_v59 = vshrl.u32 %v1432_v36, 7 }
 0x3c0   :  { %1897 = vmatmul.mubr.msk.f32.gmra.mxu1 %vm357_vm2, %v1079_v44  ;;  %v1642_v44 = vld [vmem:[%s2755_s3 + $0x80] sm:$0xff] }
 0x3c1   :  { %v2000_v54 = vpop.eup %1999  ;;  %1899 = vmatprep.mubr.msk.f32.mxu1 %vm357_vm2, %v1080_v56  ;;  %v1434_v52 = vsub.s32 0, %v1433_v59 }
 0x3c2   :  { %v1081_v22 = vmul.f32 %v2000_v54, %v2612_v25 }
 0x3c3   :  { %v1435_v56 = vrot.slane %v1642_v44, %v1434_v52 }
 0x3c4   :  { %1900 = vmatmul.mubr.msk.f32.gmra.mxu1 %vm357_vm2, %v1081_v22 }
 0x460   :  { %v1874_v3 = vpop.f32.mrf.mxu1 }
 0x462   :  { %v1211_v16 = vpop.f32.mrf.mxu1 }
 0x464   :  { %v1877_v55 = vpop.f32.mrf.mxu1 }
 0x466   :  { %v1221_v13 = vpop.f32.mrf.mxu1 }
 0x468   :  { %v1880_v14 = vpop.f32.mrf.mxu1 }
 0x46a   :  { %v1231_v38 = vpop.f32.mrf.mxu1 }
 0x46c   :  { %v1883_v26 = vpop.f32.mrf.mxu1 }
 0x46e   :  { %v1241_v6 = vpop.f32.mrf.mxu1 }
 0x470   :  { %v1886_v34 = vpop.f32.mrf.mxu1 }
 0x472   :  { %v1251_v7 = vpop.f32.mrf.mxu1 }
 0x474   :  { %v1889_v30 = vpop.f32.mrf.mxu1 }
 0x475   :  { %v1327_v24 = vmul.f32 %v1889_v30, %v2307_v27  ;;  %v1323_v27 = vmul.f32 %v1883_v26, %v2279_v15  ;;  %v1319_v15 = vmul.f32 %v1877_v55, %v2256_v5 }
 0x476   :  { %v1261_v25 = vpop.f32.mrf.mxu1 }
 0x478   :  { %v1892_v31 = vpop.f32.mrf.mxu1 }
 0x479   :  { %v1329_v10 = vmul.f32 %v1892_v31, %v2321_v33  ;;  %v1325_v33 = vmul.f32 %v1886_v34, %v2293_v21  ;;  %v1321_v21 = vmul.f32 %v1880_v14, %v2264_v8  ;;  %v1317_v8 = vmul.f32 %v1874_v3, %v2244_v62 }
 0x47a   :  { %v1271_v12 = vpop.f32.mrf.mxu1 }
 0x47b   :  { %v1328_v20 = vmul.f32 %v1271_v12, %v2326_v35  ;;  %v1324_v35 = vmul.f32 %v1251_v7, %v2298_v23  ;;  %v1320_v23 = vmul.f32 %v1231_v38, %v2270_v11  ;;  %v1316_v11 = vmul.f32 %v1211_v16, %v2239_v61 }
 0x47c   :  { %v1895_v46 = vpop.f32.mrf.mxu1 }
 0x47d   :  { %v1331_v32 = vmul.f32 %v1895_v46, %v2335_v39  ;;  %v1326_v39 = vmul.f32 %v1261_v25, %v2312_v29  ;;  %v1322_v29 = vmul.f32 %v1241_v6, %v2284_v17  ;;  %v1318_v17 = vmul.f32 %v1221_v13, %v2251_v4 }
 0x47e   :  { %v1281_v43 = vpop.f32.mrf.mxu1 }
 0x47f   :  { %v1330_v49 = vmul.f32 %v1281_v43, %v2340_v41  ;;  %1346 = vmatpush1.msra.mxu0 %v1331_v32 }
 0x480   :  { %1347 = vmatprep.subr.mxu0 %v2001_v0  ;;  %v1898_v41 = vpop.f32.mrf.mxu1 }
 0x481   :  { %1348 = vmatpush1.msra.mxu0 %v1330_v49  ;;  %v1333_v62 = vmul.f32 %v1898_v41, %v2349_v45  ;;  %v1641_v45 = vld [vmem:[%s2755_s3 + $0x78] sm:$0xff] }
 0x482   :  { %1349 = vmatprep.subr.mxu0 %v2001_v0  ;;  %v1291_v28 = vpop.f32.mrf.mxu1 }
 0x483   :  { %1350 = vmatpush1.msra.mxu0 %v1329_v10  ;;  %v1332_v61 = vmul.f32 %v1291_v28, %v2354_v47  ;;  %v1640_v47 = vld [vmem:[%s2755_s3 + $0x70] sm:$0xff] }
 0x484   :  { %1351 = vmatprep.subr.mxu0 %v2001_v0  ;;  %v1901_v50 = vpop.f32.mrf.mxu1 }
 0x485   :  { %1352 = vmatpush1.msra.mxu0 %v1328_v20  ;;  %v1335_v5 = vmul.f32 %v1901_v50, %v2363_v51  ;;  %v1310_v51 = vld [vmem:[%s2761_s6] sm:$0xff] }
 0x486   :  { %1353 = vmatprep.subr.mxu0 %v2001_v0  ;;  %v1301_v1 = vpop.f32.mrf.mxu1 }
 0x487   :  { %1354 = vmatpush1.msra.mxu0 %v1327_v24  ;;  %v1334_v4 = vmul.f32 %v1301_v1, %v2368_v53  ;;  %v1313_v53 = vld [vmem:[%s2761_s6 + $0x18] sm:$0xff] }
 0x488   :  { %1355 = vmatprep.subr.mxu0 %v2001_v0 }
 0x489   :  { %1356 = vmatpush1.msra.mxu0 %v1326_v39 }
 0x48a   :  { %1357 = vmatprep.subr.mxu0 %v2001_v0 }
 0x48b   :  { %1358 = vmatpush1.msra.mxu0 %v1325_v33 }
 0x48c   :  { %1359 = vmatprep.subr.mxu0 %v2001_v0 }
 0x48d   :  { %1360 = vmatpush1.msra.mxu0 %v1324_v35 }
 0x48e   :  { %1361 = vmatprep.subr.mxu0 %v2001_v0 }
 0x48f   :  { %1362 = vmatpush1.msra.mxu0 %v1323_v27 }
 0x490   :  { %1363 = vmatprep.subr.mxu0 %v2001_v0 }
 0x491   :  { %1364 = vmatpush1.msra.mxu0 %v1322_v29 }
 0x492   :  { %1365 = vmatprep.subr.mxu0 %v2001_v0 }
 0x493   :  { %1366 = vmatpush1.msra.mxu0 %v1321_v21 }
 0x494   :  { %1367 = vmatprep.subr.mxu0 %v2001_v0 }
 0x495   :  { %1368 = vmatpush1.msra.mxu0 %v1320_v23 }
 0x496   :  { %1369 = vmatprep.subr.mxu0 %v2001_v0 }
 0x497   :  { %1370 = vmatpush1.msra.mxu0 %v1319_v15 }
 0x498   :  { %1371 = vmatprep.subr.mxu0 %v2001_v0 }
 0x499   :  { %1372 = vmatpush1.msra.mxu0 %v1318_v17 }
 0x49a   :  { %1373 = vmatprep.subr.mxu0 %v2001_v0 }
 0x49b   :  { %1374 = vmatpush1.msra.mxu0 %v1317_v8 }
 0x49c   :  { %1375 = vmatprep.subr.mxu0 %v2001_v0 }
 0x49d   :  { %1376 = vmatpush1.msra.mxu0 %v1316_v11 }
 0x49e   :  { %1401 = vmatprep.subr.mxu0 %v2001_v0 }
 0x49f   :  { %1402 = vmatpush2.msra.mxu0 %v1335_v5 }
 0x4a0   :  { %1403 = vmatprep.subr.mxu0 %v2001_v0 }
 0x4a1   :  { %1404 = vmatpush2.msra.mxu0 %v1334_v4 }
 0x4a2   :  { %1405 = vmatprep.subr.mxu0 %v2001_v0 }
 0x4a3   :  { %1406 = vmatpush2.msra.mxu0 %v1333_v62 }
 0x4a4   :  { %1407 = vmatprep.subr.mxu0 %v2001_v0 }
 0x4a5   :  { %1408 = vmatpush2.msra.mxu0 %v1332_v61 }
 0x4a6   :  { %1410 = vmatmul.mubr.f32.vlgmr.msra.gmra.mxu0 %v1310_v51  ;;  %1902 = vmatprep.subr.mxu0 %v2001_v0 }
 0x4a7   :  { %1636 = vmatprep.mubr.msk.f32.mxu0 %vm33_vm1, %v1313_v53  ;;  %1903 = vmatpush3.msra.mxu0 %v1641_v45 }
 0x4a8   :  { %1904 = vmatprep.subr.mxu0 %v2001_v0 }
 0x4a9   :  { %1905 = vmatpush3.msra.mxu0 %v1640_v47 }
 0x4aa   :  { %1415 = vmatmul.mubr.f32.gmra.mxu0 %v1312_v2  ;;  %1906 = vmatprep.subr.mxu0 %v2001_v0 }
 0x4ab   :  { %1637 = vmatprep.mubr.msk.f32.mxu0 %vm33_vm1, %v1315_v57  ;;  %1907 = vmatpush3.msra.mxu0 %v1639_v42 }
 0x4ac   :  { %1908 = vmatprep.subr.mxu0 %v2001_v0 }
 0x4ad   :  { %1909 = vmatpush3.msra.mxu0 %v1638_v18 }
 0x4ae   :  { %1420 = vmatmul.mubr.f32.gmra.mxu0 %v1314_v37 }
 0x4af   :  { %1910 = vmatprep.mubr.msk.f32.mxu0 %vm2002_vm0, %v2001_v0 }
 0x566   :  { %v1411_v19 = vpop.f32.mrf.mxu0 }
 0x567   :  { %1911 = vmatmul.mubr.msk.f32.vlgmr.msra.gmra.mxu0 %vm33_vm1, %v1411_v19 }
 0x568   :  { %v1413_v40 = vpop.f32.mrf.mxu0  ;;  %1913 = vmatprep.mubr.msk.f32.mxu0 %vm2002_vm0, %v2001_v0 }
 0x56a   :  { %v1416_v63 = vpop.f32.mrf.mxu0 }
 0x56b   :  { %1914 = vmatmul.mubr.msk.f32.gmra.mxu0 %vm33_vm1, %v1416_v63 }
 0x56c   :  { %v1418_v48 = vpop.f32.mrf.mxu0  ;;  %1916 = vmatprep.mubr.msk.f32.mxu0 %vm2002_vm0, %v2001_v0 }
 0x56e   :  { %v1421_v58 = vpop.f32.mrf.mxu0 }
 0x56f   :  { %1917 = vmatmul.mubr.msk.f32.gmra.mxu0 %vm33_vm1, %v1421_v58 }
 0x570   :  { %v1423_v60 = vpop.f32.mrf.mxu0 }
 0x627   :  { %v1511_v54 = vpop.f32.mrf.mxu0 }
 0x628   :  { %v1512_v22 = vadd.f32 %v1511_v54, %v1435_v56 }
 0x629   :  { %v1912_v9 = vpop.f32.mrf.mxu0 }
 0x62a   :  { %1525 = vst.msk [vmem:[%s2762_s7] sm:$0xff] %vm33_vm1, %v1512_v22 }
 0x62b   :  { %v1516_v0 = vpop.f32.mrf.mxu0 }
 0x62c   :  { %v1517_v3 = vadd.f32 %v1516_v0, %v1435_v56 }
 0x62d   :  { %v1915_v16 = vpop.f32.mrf.mxu0 }
 0x62e   :  { %1526 = vst.msk [vmem:[%s2762_s7 + $0x8] sm:$0xff] %vm33_vm1, %v1517_v3 }
 0x62f   :  { %v1521_v55 = vpop.f32.mrf.mxu0 }
 0x630   :  { %v1522_v13 = vadd.f32 %v1521_v55, %v1435_v56 }
 0x631   :  { %v1918_v14 = vpop.f32.mrf.mxu0 }
 0x632   :  { %1528 = vst.msk [vmem:[%s2762_s7 + $0x10] sm:$0xf] %vm1527_vm4, %v1522_v13 }

</bundles_post_ra>
